<compile_context>
chip_gen: v6e
topology: v6e:2x2x1
jax: 0.10.0
libtpu: 0.0.40
codegen_flags: <defaults>
</compile_context>

<pallas_src>
import functools

import jax
import jax.numpy as jnp
from jax import lax
from jax.experimental import pallas as pl
from jax.experimental.pallas import tpu as pltpu

SLOPE = 0.8


def _round_up(x, m):
    return (x + m - 1) // m * m


def _leaky_relu(x, slope):
    return jnp.where(x >= 0, x, slope * x)


# ------------------------------ Pallas kernel ------------------------------ #
def _double_conv_kernel(x_ref, w1_ref, b1_ref, w2_ref, b2_ref, mask_ref,
                        o_ref, stk1_ref, stk2_ref, *, H, W, OFF, slope):
    # x_ref   : (1, Cin, P)     bf16  raw input, lane-dense (P = H*W)
    # w1_ref  : (3, C1, 3*Cin)  bf16  per-dy weights, K ordered [dx, channel]
    # b1_ref  : (C1, 1)         f32
    # w2_ref  : (3, C2, 3*C1)   bf16
    # b2_ref  : (C2, 1)         f32
    # mask_ref: (2, P)          bf16  row0: col != 0, row1: col != W-1
    # o_ref   : (1, C2, P)      out dtype
    # stk1_ref: (3*Cin, L)      bf16  padded, dx-stacked layer-1 operand
    # stk2_ref: (3*C1, L)       bf16  padded, dx-stacked layer-2 operand
    P = H * W

    mask_l = mask_ref[0:1, :]      # zeroes column 0      (dx == 0 taps)
    mask_r = mask_ref[1:2, :]      # zeroes column W - 1  (dx == 2 taps)

    def conv3x3(act, w_ref, b_ref, stk_ref):
        """act (c_in, P) bf16 -> pre-activation (c_out, P) f32."""
        c_in = act.shape[0]
        c_out = w_ref.shape[1]

        # Vertical zero halo: only the two W-wide bands actually read by the
        # dy == 0 / dy == 2 taps.  Rewritten every grid step (2*W lanes, cheap)
        # so correctness does not depend on which core ran grid step 0.
        zeros_band = jnp.zeros((3 * c_in, W), stk_ref.dtype)
        stk_ref[:, OFF - W:OFF] = zeros_band
        stk_ref[:, OFF + P:OFF + P + W] = zeros_band

        # dx == 1 (centre) block at the lane-aligned interior offset.
        stk_ref[c_in:2 * c_in, OFF:OFF + P] = act
        # dx == 0 / dx == 2 blocks: ONE shifted read + ONE column mask each,
        # hoisted out of the tap loop.  The +-1 columns fall in the zeroed
        # halo band, and the masks kill cross-row contamination.
        stk_ref[0:c_in, OFF:OFF + P] = (
            stk_ref[c_in:2 * c_in, OFF - 1:OFF - 1 + P] * mask_l)
        stk_ref[2 * c_in:3 * c_in, OFF:OFF + P] = (
            stk_ref[c_in:2 * c_in, OFF + 1:OFF + 1 + P] * mask_r)

        # 3 MXU dots with K = 3*c_in (instead of 9 dots with K = c_in).
        acc = jnp.zeros((c_out, P), jnp.float32)
        for dy in range(3):
            start = OFF + (dy - 1) * W                   # static offset
            acc = acc + jnp.dot(w_ref[dy], stk_ref[:, start:start + P],
                                preferred_element_type=jnp.float32)
        return acc + b_ref[...]

    # ---- layer 1 ----
    a1 = conv3x3(x_ref[0], w1_ref, b1_ref, stk1_ref)
    y1 = _leaky_relu(a1, slope).astype(stk2_ref.dtype)   # stays in VMEM
    # ---- layer 2 ----
    a2 = conv3x3(y1, w2_ref, b2_ref, stk2_ref)
    o_ref[0] = _leaky_relu(a2, slope).astype(o_ref.dtype)


# ------------------------------- JAX wrapper -------------------------------- #
def double_conv_pallas(x_nchw, params, *, slope=SLOPE,
                       compute_dtype=jnp.bfloat16, out_dtype=None):
    """Fused DoubleConv forward. params = [(w1, b1), (w2, b2)], weights OIHW."""
    (w1, b1), (w2, b2) = params
    n, cin, h, w = x_nchw.shape
    c1, c2 = w1.shape[0], w2.shape[0]
    assert w1.shape == (c1, cin, 3, 3) and w2.shape == (c2, c1, 3, 3)
    p = h * w
    assert p % 128 == 0, "H*W must be a multiple of 128 (lane-dense layout)"
    assert w >= 2, "column-mask trick needs W >= 2"
    if out_dtype is None:
        out_dtype = compute_dtype        # next RevealNet layer consumes bf16

    off = max(_round_up(w, 128), 128)    # lane-aligned interior offset (>= W)
    scratch_l = off + p + off            # [halo | interior | halo]

    # Layout / dtype prep (once per call, in XLA).  Raw input only: no im2col.
    x_flat = x_nchw.reshape(n, cin, p).astype(compute_dtype)

    def prep_w(wgt):
        co, ci = wgt.shape[0], wgt.shape[1]
        # (O, I, ky, kx) -> (ky, O, kx*I): one (c_out, 3*c_in) matrix per dy,
        # K ordered [dx-block, channel] to match the stacked scratch rows.
        return (jnp.transpose(wgt, (2, 0, 3, 1))
                .reshape(3, co, 3 * ci).astype(compute_dtype))

    w1_r, w2_r = prep_w(w1), prep_w(w2)
    b1_col = b1.reshape(c1, 1).astype(jnp.float32)
    b2_col = b2.reshape(c2, 1).astype(jnp.float32)
    cols = jnp.arange(p, dtype=jnp.int32) % w
    masks = jnp.stack([(cols != 0), (cols != w - 1)]).astype(compute_dtype)

    flops = 2 * n * p * 9 * (c1 * cin + c2 * c1)
    bytes_accessed = int(
        (x_flat.size + w1_r.size + w2_r.size + masks.size) * 2
        + (b1_col.size + b2_col.size) * 4
        + n * c2 * p * jnp.dtype(out_dtype).itemsize)

    out = pl.pallas_call(
        functools.partial(_double_conv_kernel, H=h, W=w, OFF=off, slope=slope),
        out_shape=jax.ShapeDtypeStruct((n, c2, p), out_dtype),
        grid=(n,),
        in_specs=[
            pl.BlockSpec((1, cin, p), lambda i: (i, 0, 0)),
            pl.BlockSpec((3, c1, 3 * cin), lambda i: (0, 0, 0)),
            pl.BlockSpec((c1, 1), lambda i: (0, 0)),
            pl.BlockSpec((3, c2, 3 * c1), lambda i: (0, 0, 0)),
            pl.BlockSpec((c2, 1), lambda i: (0, 0)),
            pl.BlockSpec((2, p), lambda i: (0, 0)),
        ],
        out_specs=pl.BlockSpec((1, c2, p), lambda i: (i, 0, 0)),
        scratch_shapes=[
            pltpu.VMEM((3 * cin, scratch_l), compute_dtype),
            pltpu.VMEM((3 * c1, scratch_l), compute_dtype),
        ],
        compiler_params=pltpu.CompilerParams(
            dimension_semantics=("parallel",)),
        cost_estimate=pl.CostEstimate(flops=flops, transcendentals=0,
                                      bytes_accessed=bytes_accessed),
    )(x_flat, w1_r, b1_col, w2_r, b2_col, masks)

    return out.reshape(n, c2, h, w)      # already NCHW-ordered, no transpose


# ----------------------------- pure-JAX reference --------------------------- #
def double_conv_ref(x, params, *, slope=SLOPE, compute_dtype=jnp.bfloat16):
    """Same math, same MXU precision (bf16 operands, f32 accumulation)."""
    for (wgt, b) in params:
        y = lax.conv_general_dilated(
            x.astype(compute_dtype), wgt.astype(compute_dtype),
            window_strides=(1, 1), padding=((1, 1), (1, 1)),
            dimension_numbers=("NCHW", "OIHW", "NCHW"),
            preferred_element_type=jnp.float32)
        y = y + b[None, :, None, None].astype(jnp.float32)
        x = jnp.where(y >= 0, y, slope * y)
    return x


# ----------------------------------- main ----------------------------------- #
if __name__ == "__main__":
    import numpy as np

    key = jax.random.PRNGKey(0)
    k_x, k_w1, k_b1, k_w2, k_b2 = jax.random.split(key, 5)

    N, C_in, C_out, H, W = 2, 4, 8, 16, 16
    x = jax.random.normal(k_x, (N, C_in, H, W), jnp.float32)

    def init_conv(kw, kb, cin, cout):
        bound = 1.0 / np.sqrt(cin * 9.0)
        wgt = jax.random.uniform(kw, (cout, cin, 3, 3), jnp.float32, -bound, bound)
        b = jax.random.uniform(kb, (cout,), jnp.float32, -bound, bound)
        return wgt, b

    params = [init_conv(k_w1, k_b1, C_in, C_out),
              init_conv(k_w2, k_b2, C_out, C_out)]

    out = jax.block_until_ready(double_conv_pallas(x, params))
    ref = jax.block_until_ready(double_conv_ref(x, params))

    assert out.shape == (N, C_out, H, W), out.shape
    # Kernel emits bf16 (see perf notes) -> compare against the f32 reference
    # with a correspondingly loosened tolerance.
    np.testing.assert_allclose(np.asarray(out.astype(jnp.float32)),
                               np.asarray(ref),
                               rtol=2e-2, atol=2e-2)
    print("KERNEL_OK")
</pallas_src>

<mosaic_0001>
module attributes {stable_mosaic.version = 11 : i64} {
  func.func @_double_conv_kernel(%arg0: i32, %arg1: memref<1x4x256xbf16, #tpu.memory_space<vmem>>, %arg2: memref<3x8x12xbf16, #tpu.memory_space<vmem>>, %arg3: memref<8x1xf32, #tpu.memory_space<vmem>>, %arg4: memref<3x8x24xbf16, #tpu.memory_space<vmem>>, %arg5: memref<8x1xf32, #tpu.memory_space<vmem>>, %arg6: memref<2x256xbf16, #tpu.memory_space<vmem>>, %arg7: memref<1x8x256xbf16, #tpu.memory_space<vmem>>, %arg8: memref<12x512xbf16, #tpu.memory_space<vmem>>, %arg9: memref<24x512xbf16, #tpu.memory_space<vmem>>) attributes {dimension_semantics = [#tpu.dimension_semantics<parallel>], iteration_bounds = array<i64: 2>, scalar_prefetch = 0 : i64, scratch_operands = 2 : i64, tpu.core_type = #tpu.core_type<tc>, window_params = [{transform_indices = @transform_0, window_bounds = array<i64: 1, 4, 256>}, {pipeline_mode = #tpu.pipeline_mode<synchronous>, transform_indices = @transform_1, window_bounds = array<i64: 3, 8, 12>}, {pipeline_mode = #tpu.pipeline_mode<synchronous>, transform_indices = @transform_2, window_bounds = array<i64: 8, 1>}, {pipeline_mode = #tpu.pipeline_mode<synchronous>, transform_indices = @transform_3, window_bounds = array<i64: 3, 8, 24>}, {pipeline_mode = #tpu.pipeline_mode<synchronous>, transform_indices = @transform_4, window_bounds = array<i64: 8, 1>}, {pipeline_mode = #tpu.pipeline_mode<synchronous>, transform_indices = @transform_5, window_bounds = array<i64: 2, 256>}, {transform_indices = @transform_6, window_bounds = array<i64: 1, 8, 256>}]} {
    %c0 = arith.constant 0 : index
    %c0_0 = arith.constant 0 : index
    %0 = vector.load %arg6[%c0, %c0_0] : memref<2x256xbf16, #tpu.memory_space<vmem>>, vector<1x256xbf16>
    %c1 = arith.constant 1 : index
    %c0_1 = arith.constant 0 : index
    %1 = vector.load %arg6[%c1, %c0_1] : memref<2x256xbf16, #tpu.memory_space<vmem>>, vector<1x256xbf16>
    %c0_2 = arith.constant 0 : index
    %c0_3 = arith.constant 0 : index
    %c0_4 = arith.constant 0 : index
    %2 = vector.load %arg1[%c0_2, %c0_3, %c0_4] : memref<1x4x256xbf16, #tpu.memory_space<vmem>>, vector<1x4x256xbf16>
    %3 = vector.shape_cast %2 : vector<1x4x256xbf16> to vector<4x256xbf16>
    %cst = arith.constant 0.000000e+00 : bf16
    %4 = vector.broadcast %cst : bf16 to vector<12x16xbf16>
    %c0_5 = arith.constant 0 : index
    %c112 = arith.constant 112 : index
    %5 = vector.load %arg8[%c0_5, %c112] : memref<12x512xbf16, #tpu.memory_space<vmem>>, vector<12x16xbf16>
    tpu.vector_store %arg8[%c0_5, %c112], %4 {strides = array<i32>} : memref<12x512xbf16, #tpu.memory_space<vmem>>, vector<12x16xbf16>,
    %c0_6 = arith.constant 0 : index
    %c384 = arith.constant 384 : index
    %6 = vector.load %arg8[%c0_6, %c384] : memref<12x512xbf16, #tpu.memory_space<vmem>>, vector<12x16xbf16>
    tpu.vector_store %arg8[%c0_6, %c384], %4 {strides = array<i32>} : memref<12x512xbf16, #tpu.memory_space<vmem>>, vector<12x16xbf16>,
    %c4 = arith.constant 4 : index
    %c128 = arith.constant 128 : index
    %7 = vector.load %arg8[%c4, %c128] : memref<12x512xbf16, #tpu.memory_space<vmem>>, vector<4x256xbf16>
    tpu.vector_store %arg8[%c4, %c128], %3 {strides = array<i32>} : memref<12x512xbf16, #tpu.memory_space<vmem>>, vector<4x256xbf16>,
    %c4_7 = arith.constant 4 : index
    %c127 = arith.constant 127 : index
    %8 = vector.load %arg8[%c4_7, %c127] : memref<12x512xbf16, #tpu.memory_space<vmem>>, vector<4x256xbf16>
    %9 = vector.broadcast %0 : vector<1x256xbf16> to vector<4x256xbf16>
    %10 = arith.mulf %8, %9 : vector<4x256xbf16>
    %c0_8 = arith.constant 0 : index
    %c128_9 = arith.constant 128 : index
    %11 = vector.load %arg8[%c0_8, %c128_9] : memref<12x512xbf16, #tpu.memory_space<vmem>>, vector<4x256xbf16>
    tpu.vector_store %arg8[%c0_8, %c128_9], %10 {strides = array<i32>} : memref<12x512xbf16, #tpu.memory_space<vmem>>, vector<4x256xbf16>,
    %c4_10 = arith.constant 4 : index
    %c129 = arith.constant 129 : index
    %12 = vector.load %arg8[%c4_10, %c129] : memref<12x512xbf16, #tpu.memory_space<vmem>>, vector<4x256xbf16>
    %13 = vector.broadcast %1 : vector<1x256xbf16> to vector<4x256xbf16>
    %14 = arith.mulf %12, %13 : vector<4x256xbf16>
    %c8 = arith.constant 8 : index
    %c128_11 = arith.constant 128 : index
    %15 = vector.load %arg8[%c8, %c128_11] : memref<12x512xbf16, #tpu.memory_space<vmem>>, vector<4x256xbf16>
    tpu.vector_store %arg8[%c8, %c128_11], %14 {strides = array<i32>} : memref<12x512xbf16, #tpu.memory_space<vmem>>, vector<4x256xbf16>,
    %cst_12 = arith.constant 0.000000e+00 : f32
    %16 = vector.broadcast %cst_12 : f32 to vector<8x256xf32>
    %c0_13 = arith.constant 0 : index
    %c0_14 = arith.constant 0 : index
    %c0_15 = arith.constant 0 : index
    %17 = vector.load %arg2[%c0_13, %c0_14, %c0_15] : memref<3x8x12xbf16, #tpu.memory_space<vmem>>, vector<1x8x12xbf16>
    %18 = vector.shape_cast %17 : vector<1x8x12xbf16> to vector<8x12xbf16>
    %c0_16 = arith.constant 0 : index
    %c112_17 = arith.constant 112 : index
    %19 = vector.load %arg8[%c0_16, %c112_17] : memref<12x512xbf16, #tpu.memory_space<vmem>>, vector<12x256xbf16>
    %cst_18 = arith.constant dense<0.000000e+00> : vector<8x256xf32>
    %20 = tpu.matmul %18, %19, %cst_18 {dimension_numbers = #tpu.dot_dimension_numbers<[1], [0], [0], [1], [0, 0, 1, 1], [], []>} : vector<8x12xbf16>, vector<12x256xbf16>, vector<8x256xf32> -> vector<8x256xf32>
    %21 = arith.addf %16, %20 : vector<8x256xf32>
    %c1_19 = arith.constant 1 : index
    %c0_20 = arith.constant 0 : index
    %c0_21 = arith.constant 0 : index
    %22 = vector.load %arg2[%c1_19, %c0_20, %c0_21] : memref<3x8x12xbf16, #tpu.memory_space<vmem>>, vector<1x8x12xbf16>
    %23 = vector.shape_cast %22 : vector<1x8x12xbf16> to vector<8x12xbf16>
    %c0_22 = arith.constant 0 : index
    %c128_23 = arith.constant 128 : index
    %24 = vector.load %arg8[%c0_22, %c128_23] : memref<12x512xbf16, #tpu.memory_space<vmem>>, vector<12x256xbf16>
    %cst_24 = arith.constant dense<0.000000e+00> : vector<8x256xf32>
    %25 = tpu.matmul %23, %24, %cst_24 {dimension_numbers = #tpu.dot_dimension_numbers<[1], [0], [0], [1], [0, 0, 1, 1], [], []>} : vector<8x12xbf16>, vector<12x256xbf16>, vector<8x256xf32> -> vector<8x256xf32>
    %26 = arith.addf %21, %25 : vector<8x256xf32>
    %c2 = arith.constant 2 : index
    %c0_25 = arith.constant 0 : index
    %c0_26 = arith.constant 0 : index
    %27 = vector.load %arg2[%c2, %c0_25, %c0_26] : memref<3x8x12xbf16, #tpu.memory_space<vmem>>, vector<1x8x12xbf16>
    %28 = vector.shape_cast %27 : vector<1x8x12xbf16> to vector<8x12xbf16>
    %c0_27 = arith.constant 0 : index
    %c144 = arith.constant 144 : index
    %29 = vector.load %arg8[%c0_27, %c144] : memref<12x512xbf16, #tpu.memory_space<vmem>>, vector<12x256xbf16>
    %cst_28 = arith.constant dense<0.000000e+00> : vector<8x256xf32>
    %30 = tpu.matmul %28, %29, %cst_28 {dimension_numbers = #tpu.dot_dimension_numbers<[1], [0], [0], [1], [0, 0, 1, 1], [], []>} : vector<8x12xbf16>, vector<12x256xbf16>, vector<8x256xf32> -> vector<8x256xf32>
    %31 = arith.addf %26, %30 : vector<8x256xf32>
    %c0_29 = arith.constant 0 : index
    %c0_30 = arith.constant 0 : index
    %32 = vector.load %arg3[%c0_29, %c0_30] : memref<8x1xf32, #tpu.memory_space<vmem>>, vector<8x1xf32>
    %33 = vector.broadcast %32 : vector<8x1xf32> to vector<8x256xf32>
    %34 = arith.addf %31, %33 : vector<8x256xf32>
    %cst_31 = arith.constant 0.000000e+00 : f32
    %35 = vector.broadcast %cst_31 : f32 to vector<8x256xf32>
    %36 = arith.cmpf oge, %34, %35 : vector<8x256xf32>
    %cst_32 = arith.constant 8.000000e-01 : f32
    %37 = vector.broadcast %cst_32 : f32 to vector<8x256xf32>
    %38 = arith.mulf %37, %34 : vector<8x256xf32>
    %39 = arith.select %36, %34, %38 : vector<8x256xi1>, vector<8x256xf32>
    %40 = arith.truncf %39 : vector<8x256xf32> to vector<8x256xbf16>
    %cst_33 = arith.constant 0.000000e+00 : bf16
    %41 = vector.broadcast %cst_33 : bf16 to vector<24x16xbf16>
    %c0_34 = arith.constant 0 : index
    %c112_35 = arith.constant 112 : index
    %42 = vector.load %arg9[%c0_34, %c112_35] : memref<24x512xbf16, #tpu.memory_space<vmem>>, vector<24x16xbf16>
    tpu.vector_store %arg9[%c0_34, %c112_35], %41 {strides = array<i32>} : memref<24x512xbf16, #tpu.memory_space<vmem>>, vector<24x16xbf16>,
    %c0_36 = arith.constant 0 : index
    %c384_37 = arith.constant 384 : index
    %43 = vector.load %arg9[%c0_36, %c384_37] : memref<24x512xbf16, #tpu.memory_space<vmem>>, vector<24x16xbf16>
    tpu.vector_store %arg9[%c0_36, %c384_37], %41 {strides = array<i32>} : memref<24x512xbf16, #tpu.memory_space<vmem>>, vector<24x16xbf16>,
    %c8_38 = arith.constant 8 : index
    %c128_39 = arith.constant 128 : index
    %44 = vector.load %arg9[%c8_38, %c128_39] : memref<24x512xbf16, #tpu.memory_space<vmem>>, vector<8x256xbf16>
    tpu.vector_store %arg9[%c8_38, %c128_39], %40 {strides = array<i32>} : memref<24x512xbf16, #tpu.memory_space<vmem>>, vector<8x256xbf16>,
    %c8_40 = arith.constant 8 : index
    %c127_41 = arith.constant 127 : index
    %45 = vector.load %arg9[%c8_40, %c127_41] : memref<24x512xbf16, #tpu.memory_space<vmem>>, vector<8x256xbf16>
    %46 = vector.broadcast %0 : vector<1x256xbf16> to vector<8x256xbf16>
    %47 = arith.mulf %45, %46 : vector<8x256xbf16>
    %c0_42 = arith.constant 0 : index
    %c128_43 = arith.constant 128 : index
    %48 = vector.load %arg9[%c0_42, %c128_43] : memref<24x512xbf16, #tpu.memory_space<vmem>>, vector<8x256xbf16>
    tpu.vector_store %arg9[%c0_42, %c128_43], %47 {strides = array<i32>} : memref<24x512xbf16, #tpu.memory_space<vmem>>, vector<8x256xbf16>,
    %c8_44 = arith.constant 8 : index
    %c129_45 = arith.constant 129 : index
    %49 = vector.load %arg9[%c8_44, %c129_45] : memref<24x512xbf16, #tpu.memory_space<vmem>>, vector<8x256xbf16>
    %50 = vector.broadcast %1 : vector<1x256xbf16> to vector<8x256xbf16>
    %51 = arith.mulf %49, %50 : vector<8x256xbf16>
    %c16 = arith.constant 16 : index
    %c128_46 = arith.constant 128 : index
    %52 = vector.load %arg9[%c16, %c128_46] : memref<24x512xbf16, #tpu.memory_space<vmem>>, vector<8x256xbf16>
    tpu.vector_store %arg9[%c16, %c128_46], %51 {strides = array<i32>} : memref<24x512xbf16, #tpu.memory_space<vmem>>, vector<8x256xbf16>,
    %cst_47 = arith.constant 0.000000e+00 : f32
    %53 = vector.broadcast %cst_47 : f32 to vector<8x256xf32>
    %c0_48 = arith.constant 0 : index
    %c0_49 = arith.constant 0 : index
    %c0_50 = arith.constant 0 : index
    %54 = vector.load %arg4[%c0_48, %c0_49, %c0_50] : memref<3x8x24xbf16, #tpu.memory_space<vmem>>, vector<1x8x24xbf16>
    %55 = vector.shape_cast %54 : vector<1x8x24xbf16> to vector<8x24xbf16>
    %c0_51 = arith.constant 0 : index
    %c112_52 = arith.constant 112 : index
    %56 = vector.load %arg9[%c0_51, %c112_52] : memref<24x512xbf16, #tpu.memory_space<vmem>>, vector<24x256xbf16>
    %cst_53 = arith.constant dense<0.000000e+00> : vector<8x256xf32>
    %57 = tpu.matmul %55, %56, %cst_53 {dimension_numbers = #tpu.dot_dimension_numbers<[1], [0], [0], [1], [0, 0, 1, 1], [], []>} : vector<8x24xbf16>, vector<24x256xbf16>, vector<8x256xf32> -> vector<8x256xf32>
    %58 = arith.addf %53, %57 : vector<8x256xf32>
    %c1_54 = arith.constant 1 : index
    %c0_55 = arith.constant 0 : index
    %c0_56 = arith.constant 0 : index
    %59 = vector.load %arg4[%c1_54, %c0_55, %c0_56] : memref<3x8x24xbf16, #tpu.memory_space<vmem>>, vector<1x8x24xbf16>
    %60 = vector.shape_cast %59 : vector<1x8x24xbf16> to vector<8x24xbf16>
    %c0_57 = arith.constant 0 : index
    %c128_58 = arith.constant 128 : index
    %61 = vector.load %arg9[%c0_57, %c128_58] : memref<24x512xbf16, #tpu.memory_space<vmem>>, vector<24x256xbf16>
    %cst_59 = arith.constant dense<0.000000e+00> : vector<8x256xf32>
    %62 = tpu.matmul %60, %61, %cst_59 {dimension_numbers = #tpu.dot_dimension_numbers<[1], [0], [0], [1], [0, 0, 1, 1], [], []>} : vector<8x24xbf16>, vector<24x256xbf16>, vector<8x256xf32> -> vector<8x256xf32>
    %63 = arith.addf %58, %62 : vector<8x256xf32>
    %c2_60 = arith.constant 2 : index
    %c0_61 = arith.constant 0 : index
    %c0_62 = arith.constant 0 : index
    %64 = vector.load %arg4[%c2_60, %c0_61, %c0_62] : memref<3x8x24xbf16, #tpu.memory_space<vmem>>, vector<1x8x24xbf16>
    %65 = vector.shape_cast %64 : vector<1x8x24xbf16> to vector<8x24xbf16>
    %c0_63 = arith.constant 0 : index
    %c144_64 = arith.constant 144 : index
    %66 = vector.load %arg9[%c0_63, %c144_64] : memref<24x512xbf16, #tpu.memory_space<vmem>>, vector<24x256xbf16>
    %cst_65 = arith.constant dense<0.000000e+00> : vector<8x256xf32>
    %67 = tpu.matmul %65, %66, %cst_65 {dimension_numbers = #tpu.dot_dimension_numbers<[1], [0], [0], [1], [0, 0, 1, 1], [], []>} : vector<8x24xbf16>, vector<24x256xbf16>, vector<8x256xf32> -> vector<8x256xf32>
    %68 = arith.addf %63, %67 : vector<8x256xf32>
    %c0_66 = arith.constant 0 : index
    %c0_67 = arith.constant 0 : index
    %69 = vector.load %arg5[%c0_66, %c0_67] : memref<8x1xf32, #tpu.memory_space<vmem>>, vector<8x1xf32>
    %70 = vector.broadcast %69 : vector<8x1xf32> to vector<8x256xf32>
    %71 = arith.addf %68, %70 : vector<8x256xf32>
    %cst_68 = arith.constant 0.000000e+00 : f32
    %72 = vector.broadcast %cst_68 : f32 to vector<8x256xf32>
    %73 = arith.cmpf oge, %71, %72 : vector<8x256xf32>
    %cst_69 = arith.constant 8.000000e-01 : f32
    %74 = vector.broadcast %cst_69 : f32 to vector<8x256xf32>
    %75 = arith.mulf %74, %71 : vector<8x256xf32>
    %76 = arith.select %73, %71, %75 : vector<8x256xi1>, vector<8x256xf32>
    %77 = arith.truncf %76 : vector<8x256xf32> to vector<8x256xbf16>
    %c0_70 = arith.constant 0 : index
    %c0_71 = arith.constant 0 : index
    %c0_72 = arith.constant 0 : index
    %78 = vector.load %arg7[%c0_70, %c0_71, %c0_72] : memref<1x8x256xbf16, #tpu.memory_space<vmem>>, vector<1x8x256xbf16>
    %79 = vector.shape_cast %78 : vector<1x8x256xbf16> to vector<8x256xbf16>
    %80 = vector.shape_cast %77 : vector<8x256xbf16> to vector<1x8x256xbf16>
    tpu.vector_store %arg7[%c0_70, %c0_71, %c0_72], %80 {strides = array<i32>} : memref<1x8x256xbf16, #tpu.memory_space<vmem>>, vector<1x8x256xbf16>,
    return
  }
  func.func @transform_0(%arg0: i32) -> (i32, i32, i32) {
    %c0_i32 = arith.constant 0 : i32
    %c0_i32_0 = arith.constant 0 : i32
    %c0_i32_1 = arith.constant 0 : i32
    return %arg0, %c0_i32, %c0_i32_0 : i32, i32, i32
  }
  func.func @transform_1(%arg0: i32) -> (i32, i32, i32) {
    %c0_i32 = arith.constant 0 : i32
    %c0_i32_0 = arith.constant 0 : i32
    %c0_i32_1 = arith.constant 0 : i32
    %c0_i32_2 = arith.constant 0 : i32
    return %c0_i32, %c0_i32_0, %c0_i32_1 : i32, i32, i32
  }
  func.func @transform_2(%arg0: i32) -> (i32, i32) {
    %c0_i32 = arith.constant 0 : i32
    %c0_i32_0 = arith.constant 0 : i32
    %c0_i32_1 = arith.constant 0 : i32
    return %c0_i32, %c0_i32_0 : i32, i32
  }
  func.func @transform_3(%arg0: i32) -> (i32, i32, i32) {
    %c0_i32 = arith.constant 0 : i32
    %c0_i32_0 = arith.constant 0 : i32
    %c0_i32_1 = arith.constant 0 : i32
    %c0_i32_2 = arith.constant 0 : i32
    return %c0_i32, %c0_i32_0, %c0_i32_1 : i32, i32, i32
  }
  func.func @transform_4(%arg0: i32) -> (i32, i32) {
    %c0_i32 = arith.constant 0 : i32
    %c0_i32_0 = arith.constant 0 : i32
    %c0_i32_1 = arith.constant 0 : i32
    return %c0_i32, %c0_i32_0 : i32, i32
  }
  func.func @transform_5(%arg0: i32) -> (i32, i32) {
    %c0_i32 = arith.constant 0 : i32
    %c0_i32_0 = arith.constant 0 : i32
    %c0_i32_1 = arith.constant 0 : i32
    return %c0_i32, %c0_i32_0 : i32, i32
  }
  func.func @transform_6(%arg0: i32) -> (i32, i32, i32) {
    %c0_i32 = arith.constant 0 : i32
    %c0_i32_0 = arith.constant 0 : i32
    %c0_i32_1 = arith.constant 0 : i32
    return %arg0, %c0_i32, %c0_i32_0 : i32, i32, i32
  }
}

</mosaic_0001>

<bundles_post_ra>
// kernel: tpu_custom_call.1
= control target key start
LH: loop header
LB: loop body
LE: loop exit
PB: predicated region body
PF: predicated region fallthrough
CT: control target
= control target key end

     0   :  { %s1675_s0 = inlined_call_operand.hbm [shape: bf16[2,4,256], index: 0, kind: input, shape index: {}]   ;;  %s1676_s1 = inlined_call_operand.vmem [shape: bf16[3,8,12], index: 1, kind: input, shape index: {}]   ;;  %s1677_s2 = inlined_call_operand.vmem [shape: f32[8,1], index: 2, kind: input, shape index: {}]   ;;  %s1678_s3 = inlined_call_operand.hbm [shape: bf16[3,8,24], index: 3, kind: input, shape index: {}]   ;;  %s1679_s4 = inlined_call_operand.vmem [shape: f32[8,1], index: 4, kind: input, shape index: {}]   ;;  %s1680_s5 = inlined_call_operand.vmem [shape: bf16[2,256], index: 5, kind: input, shape index: {}]   ;;  %s1681_s6 = inlined_call_operand.hbm [shape: bf16[2,8,256], index: 6, kind: output, shape index: {}]  }
   0x1   :  { %1686 = sst [smem:[#allocation13_spill]] %s1678_s3 }
   0x2   :  { %11 = vsyncpa [#allocation5], 0 }
   0x3   :  { %13 = vsyncpa [#allocation5 + $0x1], 0 }
   0x4   :  { %14 = vsyncpa [#allocation8], 0 }
   0x5   :  { %15 = vsyncpa [#allocation6], 0 }
   0x6   :  { %17 = vsyncpa [#allocation6 + $0x1], 0  ;;  %s1404_s21 = smov 0   ;;  %s1406_s22 = smov 0  }
   0x7   :  { %s1408_s23 = smov 0   ;;  %s1410_s24 = smov 0  }
   0x8 LB: > { %s1425_s25 = sadd.s32 4294967295, %s1356_s24   ;;  %s1088_s26 = sadd.s32 4294967294, %s1356_s24   ;;  %s1356_s24 = sphi %s1410_s24, %s1705_s24   ;;  %s1352_s23 = sphi %s1408_s23, %s1704_s23   ;;  %s1348_s22 = sphi %s1406_s22, %s1703_s22   ;;  %s1344_s21 = sphi %s1404_s21, %s1702_s21  }
   0x9   : > { %p43_p0 = scmp.ne.s32.totalorder %s1348_s22, %s1344_s21  ;;  %p1682_p1 = scmp.eq.s32.totalorder %s1425_s25, 0 }
   0xa   : > { %p178_p3 = scmp.eq.s32.totalorder %s1088_s26, 1  ;;  %p1089_p5 = scmp.ge.s32.totalorder %s1356_s24, 1 }
   0xb   : > { %p1434_p4 = por %p1682_p1, %p43_p0  ;;  %p185_p7 = scmp.lt.s32.totalorder %s1356_s24, 3 }
   0xc   : > { %p1439_p6 = por %p178_p3, %p43_p0  ;;  %s1358_s30 = smov [#allocation7]  }
   0xd   : > { %s1687_s27 = scalar_select %p1434_p4, 1, 0 }
   0xe   : > { %s1688_s28 = scalar_select %p1439_p6, 1, 0 }
   0xf   : > { %p1444_p8 = pnand %p1089_p5, %p185_p7  ;;  %s203_s7 = sshll.u32 %s1358_s30, 4  ;;  %s204_s7 = int_to_ptr.vmem [resolvable:$true] %s203_s7 }
  0x10   : > { %s1458_s9 = sadd.s32 1, %s1356_s24   ;;  %s30_s10 = sadd.s32 1, %s1352_s23 }
  0x11   : > { %s1689_s29 = scalar_select %p1444_p8, 1, 0 }
  0x12   : > { %p1164_p9 = pneg %p1444_p8  ;;  %s27_s11 = ssub.s32 %s1356_s24, %s1458_s9 }
  0x13   : > { %s1245_s12 = scalar_lea.vmem %s204_s7, 192  ;;  %p1253_p5 = scmp.lt.s32.totalorder %s204_s7, %s204_s7 }
  0x14   : > { %p1453_p11 = pnand %p1164_p9, %p1682_p1  ;;  %p1246_p13 = scmp.ne.s32.totalorder %s204_s7, %s1245_s12 }
  0x15   : > { %p1254_p7 = scmp.lt.s32.totalorder %s1245_s12, %s1245_s12 }
  0x16   : > { %p1236_p12 = pneg %p1453_p11 }
  0x17   : > { %p1255_p10 = por %p1254_p7, %p1253_p5 }
  0x18   : > { %p1248_p0 = pnand %p1246_p13, %p1236_p12 }
  0x1a   : > { %p1249_p3 = pneg %p1248_p0 }
  0x1c   : > { %p1256_p2 = pnand %p1255_p10, %p1249_p3 }
  0x1e   : > { %1259 = shalt.err (!%p1256_p2)
}
  0x1f   : > { %s1359_s13 = smov 64   ;;  %s1360_s14 = smov 4  }
  0x20   : > { %s1691_s3 = sld [smem:[#allocation13_spill]]  ;;  %p28_p9 = scmp.eq.s32.totalorder %s27_s11, 0 }
  0x21   : > { %p37_p12 = scmp.ne.s32.totalorder %s1352_s23, %s1348_s22  ;;  %p38_p10 = scmp.eq.s32.totalorder %s1356_s24, 0 }
  0x22   : > { %p1177_p2 = scmp.lt.s32.totalorder %s1356_s24, 2  ;;  %p1692_p0 = scmp.eq.s32.totalorder %s1425_s25, 1 }
  0x23   : > { %s1475_s17 = scalar_select %p28_p9, %s1352_s23, %s30_s10  }
  0x24   : > { %p39_p13 = por %p38_p10, %p37_p12  ;;  %p1479_p3 = por %p1692_p0, %p37_p12 }
  0x25   : > { %s223_s19 = sand.u32 1, %s1352_s23   ;;  %s1152_s20 = sshll.u32 %s1356_s24, 6 }
  0x26   : > { %1167 = dma.hbm_to_vmem [thread:$0]  (!%p1453_p11), %s1691_s3, 192, %s204_s7, [#allocation8], %s1359_s13, %s1359_s13, %s1360_s14  }
  0x27   : > { %s1693_s18 = scalar_select %p1479_p3, 1, 0 }
  0x28   : > { %s1092_s26 = sshll.u32 %s223_s19, 2  ;;  %s1488_s12 = scalar_lea.hbm %s1675_s0, %s1152_s20 }
  0x29   : > { %s227_s7 = scalar_lea.vmem [#allocation4], %s1092_s26  ;;  %p1490_p11 = pnand %p1177_p2, %p39_p13 }
  0x2a   : > { %s235_s10 = sshll.u32 %s227_s7, 4  ;;  %s224_s13 = scalar_lea.sflag [#allocation5], %s223_s19  ;;  %s236_s10 = int_to_ptr.vmem [resolvable:$true] %s235_s10 }
  0x2b   : > { %s1260_s14 = scalar_lea.hbm %s1488_s12, 64  ;;  %p1262_p7 = pneg %p1490_p11 }
  0x2c   : > { %p1261_p5 = scmp.ne.s32.totalorder %s1488_s12, %s1260_s14  ;;  %s1265_s20 = scalar_lea.hbm %s1675_s0, 128 }
  0x2d   : > { %p1266_p10 = scmp.lt.s32.totalorder %s1488_s12, %s1675_s0  ;;  %p1267_p2 = scmp.lt.s32.totalorder %s1265_s20, %s1260_s14 }
  0x2e   : > { %p1263_p9 = pnand %p1262_p7, %p1261_p5 }
  0x2f   : > { %p1268_p13 = por %p1267_p2, %p1266_p10 }
  0x30   : > { %p1264_p12 = pneg %p1263_p9 }
  0x32   : > { %p1269_p0 = pnand %p1268_p13, %p1264_p12 }
  0x34   : > { %1272 = shalt.err (!%p1269_p0)
}
  0x35   : > { %s1273_s8 = scalar_lea.vmem %s236_s10, 64  ;;  %s1361_s19 = smov [#allocation4]  }
  0x36   : > { %p1274_p1 = scmp.ne.s32.totalorder %s236_s10, %s1273_s8  ;;  %s1278_s7 = sshll.u32 %s1361_s19, 4  ;;  %s1279_s7 = int_to_ptr.vmem [resolvable:$false] %s1278_s7 }
  0x37   : > { %s1280_s3 = scalar_lea.vmem %s1279_s7, 128  ;;  %p1281_p5 = scmp.lt.s32.totalorder %s236_s10, %s1279_s7 }
  0x38   : > { %p1276_p6 = pnand %p1274_p1, %p1262_p7  ;;  %p1282_p9 = scmp.lt.s32.totalorder %s1280_s3, %s1273_s8 }
  0x3a   : > { %p1277_p3 = pneg %p1276_p6  ;;  %p1283_p4 = por %p1282_p9, %p1281_p5 }
  0x3c   : > { %p1284_p8 = pnand %p1283_p4, %p1277_p3 }
  0x3e   : > { %1287 = shalt.err (!%p1284_p8)
}
  0x3f   : > { %1171 = dma.hbm_to_vmem [thread:$0]  (!%p1490_p11), %s1488_s12, 64, %s236_s10, %s224_s13  }
  0x40   : > { %p1695_p12 = scmp.ne.s32.totalorder %s1689_s29, 0 }
  0x41   : > { %s1511_s14 = sand.u32 (!%p1695_p12), 1, %s1348_s22   ;;  %p1696_p1 = scmp.ne.s32.totalorder (!%p1695_p12), %s1687_s27, 0 }
  0x42   : > { %244 = sbr.rel (%p1695_p12) target bundleno = 1167 (0x48f), region = 44  ;;  %s1096_s15 = sshll.u32 (!%p1695_p12), %s1511_s14, 2 }
  0x43   : > { %s247_s16 = scalar_lea.sflag (!%p1695_p12), [#allocation5], %s1511_s14  ;;  %s250_s20 = scalar_lea.vmem (!%p1695_p12), [#allocation4], %s1096_s15 }
  0x47   : > { %1331 = dma.done.wait (%p1696_p1), %s247_s16, 64  }
  0x48   : > { %1333 = vsyncadd (%p1696_p1), %s247_s16, 4294967232  ;;  %p1697_p4 = scmp.eq.s32.totalorder %s1425_s25, 0 }
  0x4a   : > { %1335 = dma.done.wait (%p1697_p4), [#allocation8], 192   ;;  %p1698_p6 = pmov %p1697_p4 }
  0x4b   : > { %v319_v0 = vlaneseq  ;;  %v1362_v1 = vmov 1966171168   ;;  %vm286_vm0 = vcmask 1044352   ;;  %v1363_v4 = vmov 0   ;;  %v285_v8 = vld [vmem:[%s250_s20] sm:$0xf] }
  0x4c   : > { %1337 = vsyncadd (%p1698_p6), [#allocation8], 4294967104  ;;  %v317_v2 = vunpack.c.l.s4 %v1362_v1  ;;  %287 = vst.msk [vmem:[#allocation2] sm:$0xf] %vm286_vm0, %v1363_v4  ;;  %481 = vmatprep.mubr.bf16.mxu0 %v1363_v4  ;;  %553 = vmatprep.mubr.bf16.mxu1 %v1363_v4  ;;  %vm290_vm1 = vcmask 125952   ;;  %v295_v12 = vcombine.low %v285_v8, %v285_v8  ;;  %s1364_s29 = smov 127  }
  0x4d   : > { %v320_v3 = vshrl.u32 %v319_v0, 7  ;;  %658 = vst.msk [vmem:[#allocation3] sm:$0xf] %vm286_vm0, %v1363_v4  ;;  %659 = vst.msk [vmem:[#allocation3 + $0x10] sm:$0xf] %vm286_vm0, %v1363_v4  ;;  %1221 = vset.pattern.permute.xlu0 %v1363_v4  ;;  %s1365_s12 = smov 1  }
  0x4e   : > { %660 = vst.msk [vmem:[#allocation3 + $0x20] sm:$0xf] %vm286_vm0, %v1363_v4  ;;  %v318_v5 = vunpack.c.0.s8 %v317_v2  ;;  %v1100_v7 = vld.sshfl [vmem:[%s1680_s5] sm:$0x11 pattern:$0x75316420] }
  0x4f   : > { %291 = vst.msk [vmem:[#allocation2 + $0xc] sm:$0xf] %vm290_vm1, %v1363_v4  ;;  %661 = vst.msk [vmem:[#allocation3 + $0xc] sm:$0xf] %vm290_vm1, %v1363_v4  ;;  %v315_v9 = vcombine.high %v1100_v7, %v1100_v7  ;;  %v335_v11 = vsub.s32 0, %v320_v3  ;;  %vm352_vm2 = vcmask 1039360  }
  0x50   : > { %v321_v6 = vsub.s32 %v318_v5, %v320_v3  ;;  %662 = vst.msk [vmem:[#allocation3 + $0x1c] sm:$0xf] %vm290_vm1, %v1363_v4  ;;  %663 = vst.msk [vmem:[#allocation3 + $0x2c] sm:$0xf] %vm290_vm1, %v1363_v4  ;;  %vm372_vm3 = vcmask 7168   ;;  %vm288_vm4 = vcmask 1042304  }
  0x51   : > { %1099 = vst.sshfl [vmem:[#allocation2 + $0x4] sm:$0xf0 pattern:$0x76325410] %v295_v12  ;;  %289 = vst.msk [vmem:[#allocation2 + $0x10] sm:$0x3] %vm288_vm4, %v1363_v4 }
  0x52   : > { %v322_v10 = vrot.slane %v1100_v7, %v321_v6  ;;  %v329_v13 = vrot.slane %v315_v9, %v321_v6  ;;  %vm292_vm5 = vcmask 123904   ;;  %vm370_vm6 = vcmask 1043456   ;;  %s1366_s10 = smov 16   ;;  %v1107_v0 = vld [vmem:[%s1676_s1 + $0x4] sm:$0xf]  ;;  %s1367_s30 = smov 112  }
  0x53   : > { %293 = vst.msk [vmem:[#allocation2 + $0x1c] sm:$0x3] %vm292_vm5, %v1363_v4  ;;  %vm442_vm7 = vcmask 1045504   ;;  %vm438_vm8 = vcmask 97280   ;;  %v642_v8 = vld [vmem:[%s1677_s2] sm:$0xff]  ;;  %vm509_vm9 = vcmask 130048  }
  0x54   : > { %v331_v14 = vpack.i.b16 %v322_v10, %v322_v10  ;;  %v378_v15 = vshrl.u32 %v322_v10, 16  ;;  %v338_v17 = vpack.i.b16 %v329_v13, %v329_v13  ;;  %v385_v19 = vshrl.u32 %v329_v13, 16  ;;  %s1098_s27 = sshll.u32 %s1511_s14, 3  ;;  %s994_s26 = scalar_lea.sflag [#allocation6], %s1511_s14 }
  0x55   : > { %vm587_vm10 = vcmask 916480   ;;  %vm730_vm13 = vcmask 195584   ;;  %p1699_p3 = scmp.ne.s32.totalorder %s1693_s18, 0  ;;  %s1368_s19 = smov [#allocation9]  }
  0x56   : > { %v336_v16 = vrot.slane %v331_v14, %v335_v11  ;;  %v379_v18 = vpack.i.b16 %v378_v15, %v378_v15  ;;  %v343_v20 = vrot.slane %v338_v17, %v335_v11  ;;  %v386_v22 = vpack.i.b16 %v385_v19, %v385_v19  ;;  %v377_v33 = vld [vmem:[#allocation2 + $0xc] sm:$0xc]  ;;  %v421_v17 = vld [vmem:[%s1676_s1] sm:$0xf]  ;;  %s1292_s7 = sshll.u32 %s1368_s19, 4  ;;  %s1293_s7 = int_to_ptr.vmem [resolvable:$false] %s1292_s7 }
  0x57   : > { %v688_v6 = vld [vmem:[#allocation3 + $0x1c] sm:$0xf] }
  0x58   : > { %v384_v21 = vrot.slane %v379_v18, %v335_v11  ;;  %v1101_v23 = vcombine.low %v336_v16, %v343_v20  ;;  %v391_v24 = vrot.slane %v386_v22, %v335_v11  ;;  %v306_v27 = vld [vmem:[#allocation2 + $0x8] sm:$0xc]  ;;  %v305_v29 = vld [vmem:[#allocation2] sm:$0xcc] }
  0x59   : > { %v376_v35 = vld [vmem:[#allocation2 + $0x4] sm:$0xcc]  ;;  %v1225_v60 = vld [vmem:[#allocation2] ss:$16 sps:$4 sm:$0x3f]  }
  0x5a   : > { %349 = vrot.lane.b32.xlu0 %v1101_v23, %s1364_s29  ;;  %v1104_v25 = vcombine.low %v384_v21, %v391_v24  ;;  %v1227_v3 = vld [vmem:[#allocation2 + $0xc] ss:$16 sps:$4 sm:$0x3f]   ;;  %v1117_v22 = vld [vmem:[%s1676_s1 + $0x8] sm:$0xf] }
  0x5e   : > { %397 = vrot.lane.b32.xlu0 %v1104_v25, %s1365_s12 }
  0xcc   : > { %v350_v26 = vpop.permute.xlu0 %349 }
  0xcd   : > { %v1539_v28 = vrot.slane %v350_v26, 4 }
  0xcf   : > { %v1543_v30 = vsel %vm352_vm2, %v1539_v28, %v350_v26  ;;  %v357_v31 = vmul.bf16 %v1539_v28, %v306_v27 }
  0xd0   : > { %v398_v32 = vpop.permute.xlu0 %397  ;;  %v356_v34 = vmul.bf16 %v1543_v30, %v305_v29 }
  0xd1   : > { %v399_v36 = vrot.slane %v398_v32, 4  ;;  %v1103_v37 = vrot.slane %v357_v31, 10 }
  0xd2   : > { %v1102_v41 = vrot.slane %v356_v34, 10 }
  0xd3   : > { %v1549_v38 = vsel %vm372_vm3, %v399_v36, %v398_v32  ;;  %366 = vrot.lane.b32.xlu1 %v1103_v37, %s1365_s12  ;;  %v404_v39 = vmul.bf16 %v399_v36, %v377_v33  ;;  %v690_v7 = vmul.bf16 %v688_v6, %v399_v36 }
  0xd4   : > { %v403_v40 = vmul.bf16 %v1549_v38, %v376_v35 }
  0xd5   : > { %v1106_v43 = vrot.slane %v404_v39, 10 }
  0xd6   : > { %v1105_v42 = vrot.slane %v403_v40, 10 }
  0xd7   : > { %364 = vrot.lane.b32.xlu1 %v1102_v41, %s1365_s12 }
  0xd8   : > { %411 = vrot.lane.b32.xlu0 %v1105_v42, %s1364_s29 }
  0xdb   : > { %413 = vrot.lane.b32.xlu1 %v1106_v43, %s1364_s29 }
  0xdc   : > { %503 = vrot.lane.b32.xlu0 %v1225_v60, %s1366_s10 }
 0x145   : > { %v367_v44 = vpop.permute.xlu1 %366 }
 0x146   : > { %v369_v46 = vrot.slane %v367_v44, 4 }
 0x149   : > { %v365_v45 = vpop.permute.xlu1 %364 }
 0x14a   : > { %v368_v47 = vrot.slane %v365_v45, 4  ;;  %v412_v48 = vpop.permute.xlu0 %411 }
 0x14b   : > { %v415_v52 = vrot.slane %v412_v48, 4 }
 0x14c   : > { %v371_v49 = vsel %vm370_vm6, %v368_v47, %v369_v46 }
 0x14d   : > { %v373_v50 = vsel %vm372_vm3, %v365_v45, %v371_v49  ;;  %v414_v51 = vpop.permute.xlu1 %413 }
 0x14e   : > { %375 = vst [vmem:[#allocation2 + $0x4] sm:$0x33] %v373_v50  ;;  %v416_v53 = vrot.slane %v414_v51, 4  ;;  %v504_v10 = vpop.permute.xlu0 %503 }
 0x150   : > { %v417_v54 = vsel %vm370_vm6, %v415_v52, %v416_v53 }
 0x151   : > { %v418_v55 = vsel %vm352_vm2, %v412_v48, %v417_v54 }
 0x152   : > { %420 = vst [vmem:[#allocation2 + $0x14] sm:$0x33] %v418_v55  ;;  %v1228_v55 = vld [vmem:[#allocation3 + $0x2c] ss:$0 sps:$4 sm:$0xff]  }
 0x155   : > { %v428_v56 = vld [vmem:[#allocation2 + $0x4] sm:$0xff] }
 0x159   : > { %v429_v57 = vld [vmem:[#allocation2 + $0x14] sm:$0x33] }
 0x15a   : > { %v1109_v58 = vcombine.high %v428_v56, %v429_v57  ;;  %v1223_v59 = vld [vmem:[#allocation2 + $0x4] ss:$16 sps:$4 sm:$0x3f]   ;;  %v1108_v61 = vcombine.low %v428_v56, %v429_v57  ;;  %v1226_v2 = vld [vmem:[#allocation2 + $0x8] ss:$16 sps:$4 sm:$0x3f]  }
 0x15b   : > { %v566_v62 = vld [vmem:[#allocation2 + $0x14] sm:$0x33]  ;;  %505 = vrot.lane.b32.xlu1 %v1223_v59, %s1366_s10  ;;  %507 = vrot.lane.b32.xlu0 %v1226_v2, %s1366_s10 }
 0x15c   : > { %1110 = vmatprep.subr.msk.bf16.mxu0 %vm442_vm7, %v1109_v58  ;;  %v444_v63 = vsel %vm442_vm7, %v1108_v61, 0  ;;  %v1118_v1 = vcombine.low %v428_v56, %v566_v62  ;;  %v1119_v5 = vcombine.high %v428_v56, %v566_v62 }
 0x15d   : > { %464 = vmatpush1.bf16.msra.mxu0 %v444_v63 }
 0x15f   : > { %581 = vrot.lane.b32.xlu1 %v1118_v1, %s1367_s30  ;;  %583 = vrot.lane.b32.xlu0 %v1119_v5, %s1367_s30 }
 0x160   : > { %1111 = vmatmul.mubr.msk.bf16.vlgmr.msra.gmra.mxu0 %vm438_vm8, %v1107_v0 }
 0x161   : > { %631 = vmatprep.mubr.bf16.mxu0 %v1363_v4 }
 0x163   : > { %585 = vrot.lane.b32.xlu1 %v1227_v3, %s1367_s30  ;;  %645 = vperm.xlu0 %1221, %v642_v8  }
 0x167   : > { %695 = vrot.lane.b32.xlu1 %v690_v7, %s1364_s29 }
 0x1cd   : > { %v506_v9 = vpop.permute.xlu1 %505  ;;  %v508_v13 = vpop.permute.xlu0 %507 }
 0x1ce   : > { %v510_v12 = vsel %vm509_vm9, %v504_v10, %v506_v9  ;;  %v511_v14 = vsel %vm509_vm9, %v506_v9, %v508_v13 }
 0x1cf   : > { %1115 = vmatprep.subr.msk.bf16.mxu1 %vm442_vm7, %v511_v14  ;;  %v516_v15 = vsel %vm442_vm7, %v510_v12, 0 }
 0x1d0   : > { %536 = vmatpush1.bf16.msra.mxu1 %v516_v15 }
 0x1d1   : > { %v582_v11 = vpop.permute.xlu1 %581  ;;  %v584_v18 = vpop.permute.xlu0 %583 }
 0x1d2   : > { %v588_v19 = vsel %vm587_vm10, %v582_v11, %v584_v18  ;;  %v711_v11 = vld [vmem:[#allocation7 + $0x4] sm:$0xf] }
 0x1d3   : > { %v594_v21 = vsel %vm442_vm7, %v588_v19, 0  ;;  %1116 = vmatmul.mubr.msk.bf16.vlgmr.msra.gmra.mxu1 %vm438_vm8, %v421_v17 }
 0x1d4   : > { %773 = vmatprep.mubr.bf16.mxu1 %v1363_v4 }
 0x1d5   : > { %v586_v16 = vpop.permute.xlu1 %585 }
 0x1d6   : > { %v589_v20 = vsel %vm587_vm10, %v584_v18, %v586_v16  ;;  %v1233_v16 = vld [vmem:[#allocation3 + $0xc] ss:$16 sps:$4 sm:$0xff]  }
 0x1d7   : > { %1121 = vmatprep.subr.msk.bf16.mxu0 %vm442_vm7, %v589_v20 }
 0x1d8   : > { %614 = vmatpush1.bf16.msra.mxu0 %v594_v21 }
 0x1d9   : > { %v696_v56 = vpop.permute.xlu1 %695 }
 0x1da   : > { %v698_v58 = vrot.slane %v696_v56, 4 }
 0x1db   : > { %1122 = vmatmul.mubr.msk.bf16.vlgmr.msra.gmra.mxu0 %vm438_vm8, %v1117_v22 }
 0x1dc   : > { %862 = vmatprep.mubr.bf16.mxu0 %v1363_v4 }
 0x1de   : > { %v646_v32 = vpop.permute.xlu0 %645 }
 0x220   : > { %v483_v23 = vpop.f32.mrf.mxu0 }
 0x222   : > { %v485_v24 = vpop.f32.mrf.mxu0 }
 0x224   : > { %v487_v25 = vpop.f32.mrf.mxu0 }
 0x226   : > { %v488_v26 = vpop.f32.mrf.mxu0 }
 0x293   : > { %v555_v27 = vpop.f32.mrf.mxu1 }
 0x294   : > { %v556_v31 = vadd.f32 %v555_v27, %v483_v23 }
 0x295   : > { %v557_v29 = vpop.f32.mrf.mxu1 }
 0x296   : > { %v558_v35 = vadd.f32 %v557_v29, %v485_v24 }
 0x297   : > { %v559_v33 = vpop.f32.mrf.mxu1 }
 0x299   : > { %v560_v37 = vpop.f32.mrf.mxu1 }
 0x29a   : > { %v703_v37 = vld [vmem:[#allocation7] sm:$0xf] }
 0x29b   : > { %v633_v34 = vpop.f32.mrf.mxu0 }
 0x29c   : > { %v640_v36 = vadd.f32 %v633_v34, %v556_v31 }
 0x29d   : > { %v635_v39 = vpop.f32.mrf.mxu0 }
 0x29e   : > { %v641_v40 = vadd.f32 %v635_v39, %v558_v35  ;;  %v648_v41 = vadd.f32 %v646_v32, %v640_v36 }
 0x29f   : > { %v637_v42 = vpop.f32.mrf.mxu0 }
 0x2a0   : > { %v649_v43 = vadd.f32 %v646_v32, %v641_v40  ;;  %v652_v44 = vmul.f32 0.8, %v648_v41  ;;  %vm650_vm11 = vcmp.ge.f32.partialorder %v648_v41, 0.0 }
 0x2a1   : > { %v638_v45 = vpop.f32.mrf.mxu0 }
 0x2a2   : > { %vm651_vm12 = vcmp.ge.f32.partialorder %v649_v43, 0.0  ;;  %v653_v46 = vmul.f32 0.8, %v649_v43  ;;  %v654_v47 = vsel %vm650_vm11, %v648_v41, %v652_v44 }
 0x2a4   : > { %v655_v48 = vsel %vm651_vm12, %v649_v43, %v653_v46  ;;  %v872_v43 = vld [vmem:[#allocation7 + $0x8] sm:$0xf] }
 0x2a5   : > { %v1153_v49 = vpack.c.bf16 %v655_v48, %v654_v47 }
 0x2a7   : > { %670 = vst [vmem:[#allocation3 + $0x14] sm:$0xff] %v1153_v49  ;;  %v689_v50 = vmul.bf16 %v1153_v49, %v1549_v38 }
 0x2a9   : > { %693 = vrot.lane.b32.xlu1 %v689_v50, %s1364_s29  ;;  %s1155_s29 = sshll.u32 %s1425_s25, 7  ;;  %s1294_s25 = scalar_lea.vmem %s1293_s7, 256 }
 0x2ae   : > { %v671_v51 = vld [vmem:[#allocation3 + $0x10] sm:$0xff]  ;;  %v672_v52 = vld [vmem:[#allocation3 + $0x18] sm:$0xf] }
 0x2af   : > { %v673_v53 = vmul.bf16 %v671_v51, %v1543_v30  ;;  %v674_v54 = vmul.bf16 %v672_v52, %v1539_v28 }
 0x2b1   : > { %677 = vrot.lane.b32.xlu0 %v673_v53, %s1365_s12  ;;  %679 = vrot.lane.b32.xlu1 %v674_v54, %s1365_s12  ;;  %s282_s12 = scalar_lea.vmem [#allocation9], %s1098_s27 }
 0x2b5   : > { %910 = vrot.lane.b32.xlu1 %v1228_v55, %s1367_s30 }
 0x31b   : > { %v694_v57 = vpop.permute.xlu1 %693 }
 0x31c   : > { %v697_v59 = vrot.slane %v694_v57, 4 }
 0x31e   : > { %v699_v38 = vsel %vm370_vm6, %v697_v59, %v698_v58 }
 0x31f   : > { %v700_v60 = vsel %vm352_vm2, %v694_v57, %v699_v38 }
 0x320   : > { %702 = vst [vmem:[#allocation3 + $0x24] sm:$0xff] %v700_v60  ;;  %v1127_v61 = vcombine.high %v700_v60, %v700_v60  ;;  %v1126_v30 = vcombine.low %v700_v60, %v700_v60 }
 0x322   : > { %1128 = vmatprep.subr.msk.bf16.mxu1 %vm370_vm6, %v1127_v61  ;;  %v736_v28 = vsel %vm370_vm6, %v1126_v30, 0 }
 0x323   : > { %v678_v62 = vpop.permute.xlu0 %677  ;;  %v680_v63 = vpop.permute.xlu1 %679  ;;  %754 = vmatpush1.bf16.msra.mxu1 %v736_v28 }
 0x324   : > { %v681_v0 = vrot.slane %v678_v62, 4  ;;  %v682_v1 = vrot.slane %v680_v63, 4 }
 0x326   : > { %v683_v2 = vsel %vm370_vm6, %v681_v0, %v682_v1 }
 0x327   : > { %v684_v3 = vsel %vm372_vm3, %v678_v62, %v683_v2  ;;  %v708_v5 = vld [vmem:[#allocation3 + $0x20] sm:$0xff]  ;;  %v1231_v10 = vld [vmem:[#allocation3 + $0x28] ss:$0 sps:$4 sm:$0xff]   ;;  %v911_v17 = vpop.permute.xlu1 %910 }
 0x328   : > { %686 = vst [vmem:[#allocation3 + $0x4] sm:$0xff] %v684_v3  ;;  %v1134_v6 = vcombine.high %v708_v5, %v708_v5  ;;  %v1133_v7 = vcombine.low %v708_v5, %v708_v5  ;;  %v1124_v8 = vcombine.low %v684_v3, %v1153_v49  ;;  %v1125_v9 = vcombine.high %v684_v3, %v1153_v49 }
 0x32a   : > { %811 = vrot.lane.b32.xlu1 %v1134_v6, %s1366_s10  ;;  %809 = vrot.lane.b32.xlu0 %v1133_v7, %s1366_s10 }
 0x32b   : > { %755 = vmatprep.subr.bf16.mxu1 %v1125_v9 }
 0x32c   : > { %756 = vmatpush1.bf16.msra.mxu1 %v1124_v8 }
 0x32e   : > { %906 = vrot.lane.b32.xlu1 %v1126_v30, %s1367_s30  ;;  %813 = vrot.lane.b32.xlu0 %v1231_v10, %s1366_s10 }
 0x32f   : > { %v1232_v12 = vld [vmem:[#allocation3 + $0x8] ss:$16 sps:$4 sm:$0xff]   ;;  %1129 = vmatmul.mubr.msk.bf16.vlgmr.msra.gmra.mxu1 %vm730_vm13, %v711_v11  ;;  %v704_v13 = vld [vmem:[#allocation3] sm:$0xff] }
 0x330   : > { %959 = vmatprep.mubr.bf16.mxu1 %v1363_v4  ;;  %v1131_v14 = vcombine.high %v704_v13, %v671_v51  ;;  %v1130_v15 = vcombine.low %v704_v13, %v671_v51  ;;  %v970_v4 = vld [vmem:[%s1679_s4] sm:$0xff] }
 0x332   : > { %908 = vrot.lane.b32.xlu0 %v1127_v61, %s1367_s30  ;;  %807 = vrot.lane.b32.xlu1 %v1232_v12, %s1366_s10 }
 0x336   : > { %902 = vrot.lane.b32.xlu1 %v1125_v9, %s1367_s30  ;;  %805 = vrot.lane.b32.xlu0 %v1131_v14, %s1366_s10 }
 0x33a   : > { %900 = vrot.lane.b32.xlu1 %v1124_v8, %s1367_s30  ;;  %803 = vrot.lane.b32.xlu0 %v1130_v15, %s1366_s10  ;;  %s1008_s10 = sshll.u32 %s282_s12, 4  ;;  %s1009_s10 = int_to_ptr.vmem [resolvable:$true] %s1008_s10 }
 0x33b   : > { %s1288_s8 = scalar_lea.vmem %s1009_s10, 128  ;;  %p1295_p10 = scmp.lt.s32.totalorder %s1009_s10, %s1293_s7 }
 0x33c   : > { %p1289_p8 = scmp.ne.s32.totalorder %s1009_s10, %s1288_s8  ;;  %p1296_p2 = scmp.lt.s32.totalorder %s1294_s25, %s1288_s8 }
 0x33e   : > { %904 = vrot.lane.b32.xlu0 %v1233_v16, %s1367_s30  ;;  %s1006_s30 = scalar_lea.hbm %s1681_s6, %s1155_s29  ;;  %p1290_p11 = pnand %p1289_p8, %p1699_p3 }
 0x33f   : > { %p1297_p13 = por %p1296_p2, %p1295_p10 }
 0x340   : > { %p1291_p7 = pneg %p1290_p11 }
 0x342   : > { %973 = vperm.xlu0 %1221, %v970_v4   ;;  %p1298_p0 = pnand %p1297_p13, %p1291_p7 }
 0x39c   : > { %v812_v18 = vpop.permute.xlu1 %811  ;;  %v810_v19 = vpop.permute.xlu0 %809 }
 0x39d   : > { %v817_v20 = vsel %vm509_vm9, %v810_v19, %v812_v18 }
 0x39e   : > { %v825_v24 = vsel %vm370_vm6, %v817_v20, 0 }
 0x3a0   : > { %v907_v21 = vpop.permute.xlu1 %906  ;;  %v814_v22 = vpop.permute.xlu0 %813 }
 0x3a1   : > { %v818_v23 = vsel %vm509_vm9, %v812_v18, %v814_v22 }
 0x3a2   : > { %1136 = vmatprep.subr.msk.bf16.mxu0 %vm370_vm6, %v818_v23 }
 0x3a3   : > { %843 = vmatpush1.bf16.msra.mxu0 %v825_v24 }
 0x3a4   : > { %v808_v25 = vpop.permute.xlu1 %807  ;;  %v909_v26 = vpop.permute.xlu0 %908 }
 0x3a5   : > { %v914_v27 = vsel %vm587_vm10, %v907_v21, %v909_v26  ;;  %v915_v29 = vsel %vm587_vm10, %v909_v26, %v911_v17 }
 0x3a6   : > { %v922_v31 = vsel %vm370_vm6, %v914_v27, 0  ;;  %1144 = vmatprep.subr.msk.bf16.mxu1 %vm370_vm6, %v915_v29 }
 0x3a7   : > { %940 = vmatpush1.bf16.msra.mxu1 %v922_v31 }
 0x3a8   : > { %v806_v32 = vpop.permute.xlu0 %805  ;;  %v903_v33 = vpop.permute.xlu1 %902 }
 0x3a9   : > { %v816_v34 = vsel %vm509_vm9, %v806_v32, %v808_v25 }
 0x3aa   : > { %844 = vmatprep.subr.bf16.mxu0 %v816_v34 }
 0x3ac   : > { %v804_v35 = vpop.permute.xlu0 %803  ;;  %v901_v39 = vpop.permute.xlu1 %900 }
 0x3ad   : > { %v815_v36 = vsel %vm509_vm9, %v804_v35, %v806_v32  ;;  %v912_v42 = vsel %vm587_vm10, %v901_v39, %v903_v33 }
 0x3ae   : > { %845 = vmatpush1.bf16.msra.mxu0 %v815_v36 }
 0x3b0   : > { %v905_v40 = vpop.permute.xlu0 %904 }
 0x3b1   : > { %1137 = vmatmul.mubr.msk.bf16.vlgmr.msra.gmra.mxu0 %vm730_vm13, %v703_v37  ;;  %v913_v41 = vsel %vm587_vm10, %v903_v33, %v905_v40 }
 0x3b2   : > { %941 = vmatprep.subr.bf16.mxu1 %v913_v41 }
 0x3b3   : > { %942 = vmatpush1.bf16.msra.mxu1 %v912_v42 }
 0x3b6   : > { %1145 = vmatmul.mubr.msk.bf16.vlgmr.msra.gmra.mxu1 %vm730_vm13, %v872_v43 }
 0x3bd   : > { %v974_v56 = vpop.permute.xlu0 %973 }
 0x3ef   : > { %v775_v44 = vpop.f32.mrf.mxu1 }
 0x3f1   : > { %v777_v45 = vpop.f32.mrf.mxu1 }
 0x3f3   : > { %v779_v46 = vpop.f32.mrf.mxu1 }
 0x3f5   : > { %v780_v47 = vpop.f32.mrf.mxu1 }
 0x471   : > { %v864_v48 = vpop.f32.mrf.mxu0 }
 0x472   : > { %v865_v50 = vadd.f32 %v864_v48, %v775_v44 }
 0x473   : > { %v866_v49 = vpop.f32.mrf.mxu0 }
 0x474   : > { %v867_v53 = vadd.f32 %v866_v49, %v777_v45 }
 0x475   : > { %v868_v51 = vpop.f32.mrf.mxu0 }
 0x476   : > { %v961_v52 = vpop.f32.mrf.mxu1 }
 0x477   : > { %v968_v54 = vadd.f32 %v961_v52, %v865_v50  ;;  %v869_v55 = vpop.f32.mrf.mxu0 }
 0x478   : > { %v963_v57 = vpop.f32.mrf.mxu1 }
 0x479   : > { %v976_v58 = vadd.f32 %v974_v56, %v968_v54  ;;  %v969_v59 = vadd.f32 %v963_v57, %v867_v53 }
 0x47a   : > { %v965_v38 = vpop.f32.mrf.mxu1 }
 0x47b   : > { %v980_v60 = vmul.f32 0.8, %v976_v58  ;;  %v977_v61 = vadd.f32 %v974_v56, %v969_v59  ;;  %vm978_vm14 = vcmp.ge.f32.partialorder %v976_v58, 0.0 }
 0x47c   : > { %v966_v30 = vpop.f32.mrf.mxu1 }
 0x47d   : > { %vm979_vm15 = vcmp.ge.f32.partialorder %v977_v61, 0.0  ;;  %v981_v28 = vmul.f32 0.8, %v977_v61  ;;  %v982_v62 = vsel %vm978_vm14, %v976_v58, %v980_v60 }
 0x47f   : > { %v983_v63 = vsel %vm979_vm15, %v977_v61, %v981_v28 }
 0x480   : > { %v1154_v0 = vpack.c.bf16 %v983_v63, %v982_v62 }
 0x482   : > { %992 = vst [vmem:[%s282_s12] sm:$0xff] %v1154_v0 }
 0x483   : > { %1301 = shalt.err (!%p1298_p0)
}
 0x484   : > { %s1302_s15 = scalar_lea.hbm %s1006_s30, 128  ;;  %s1306_s20 = scalar_lea.hbm %s1681_s6, 256 }
 0x485   : > { %p1303_p5 = scmp.ne.s32.totalorder %s1006_s30, %s1302_s15  ;;  %p1307_p1 = scmp.lt.s32.totalorder %s1006_s30, %s1681_s6 }
 0x486   : > { %p1308_p4 = scmp.lt.s32.totalorder %s1306_s20, %s1302_s15 }
 0x487   : > { %p1304_p9 = pnand %p1303_p5, %p1699_p3 }
 0x488   : > { %p1309_p6 = por %p1308_p4, %p1307_p1 }
 0x489   : > { %p1305_p12 = pneg %p1304_p9 }
 0x48b   : > { %p1310_p8 = pnand %p1309_p6, %p1305_p12 }
 0x48d   : > { %1313 = shalt.err (!%p1310_p8)
}
 0x48e   : > { %1162 = dma.vmem_to_hbm [thread:$0]  (%p1699_p3), %s1009_s10, 128, %s1006_s30, %s994_s26  }
 0x48f PF: > { %s1020_s29 = sand.u32 1, %s1344_s21   ;;  %p1700_p11 = scmp.ne.s32.totalorder %s1688_s28, 0 }
 0x490   : > { %p1701_p7 = scmp.ge.s32.totalorder %s1356_s24, 2  ;;  %s1021_s12 = scalar_lea.sflag [#allocation6], %s1020_s29 }
 0x492   : > { %p1173_p10 = pnand %p1701_p7, %p1700_p11 }
 0x494   : > { %p1174_p2 = pneg %p1173_p10 }
 0x496   : > { %1339 = dma.done.wait (%p1174_p2), %s1021_s12, 128  }
 0x497   : > { %1341 = vsyncadd (%p1174_p2), %s1021_s12, 4294967168  ;;  %p20_p13 = scmp.ge.s32.totalorder %s1458_s9, 4   ;;  %s1702_s21 = smov %s1348_s22 }
 0x498   : > { %s1703_s22 = smov %s1352_s23  ;;  %s1704_s23 = smov %s1475_s17 }
 0x499   : > { %s1705_s24 = smov %s1458_s9  ;;  %22 = sbr.rel (!%p20_p13) target bundleno = 8 (0x8), region = 97 }
 0x49e   :  { %1026 = vsyncpa [#allocation5], 1 }
 0x49f   :  { %1028 = vsyncpa [#allocation5 + $0x1], 1 }
 0x4a0   :  { %1029 = vsyncpa [#allocation8], 1 }
 0x4a1   :  { %1030 = vsyncpa [#allocation6], 1 }
 0x4a2   :  { %1032 = vsyncpa [#allocation6 + $0x1], 1 }

</bundles_post_ra>
